<compile_context>
chip_gen: v6e
topology: v6e:2x2x1
jax: 0.10.0
libtpu: 0.0.40
codegen_flags: <defaults>
</compile_context>

<pallas_src>
import math
from functools import partial

import numpy as np
import jax
import jax.numpy as jnp
from jax import lax
from jax.experimental import pallas as pl
from jax.experimental.pallas import tpu as pltpu


def _round_up(x: int, m: int) -> int:
    return ((x + m - 1) // m) * m


# --------------------------------------------------------------------------
# Kernels
# --------------------------------------------------------------------------

def _embed_kernel_vmem_table(ids_ref, table_ref, pos_ref, out_ref, *, s_pad):
    """Fast path: embedding table resident in VMEM.

    ids_ref:   (B*S_pad,) int32 in SMEM (scalar-prefetched, flattened, clamped)
    table_ref: (V, E_pad) f32 VMEM block, constant block index -> DMA'd once
    pos_ref:   (T, E_pad) f32 PE tile (block index depends only on the seq tile)
    out_ref:   (T, E_pad) f32 output tile
    """
    j = pl.program_id(0)          # seq tile
    b = pl.program_id(1)          # batch row (inner grid axis)
    T = out_ref.shape[0]
    base = b * s_pad + j * T      # first flattened token of this tile

    def body(r, carry):
        tok = ids_ref[base + r]
        # Gather one embedding row from the VMEM-resident table and fuse the
        # positional-encoding add (VPU) on the way to the output tile.
        out_ref[pl.ds(r, 1), :] = (table_ref[pl.ds(tok, 1), :]
                                   + pos_ref[pl.ds(r, 1), :])
        return carry

    lax.fori_loop(0, T, body, 0, unroll=8)


def _embed_kernel_hbm_table(ids_ref, table_hbm, pos_ref, out_ref, sems, *, s_pad):
    """Fallback path: table stays in HBM, manual per-row DMA gather.

    ids_ref:   (B*S_pad,) int32 in SMEM
    table_hbm: (V, E_pad) f32 ref left in HBM (memory_space=pl.ANY)
    pos_ref:   (T, E_pad) f32 PE tile (VMEM)
    out_ref:   (T, E_pad) f32 output tile (VMEM)
    sems:      (W,) DMA semaphores -> W row copies kept in flight
    """
    j = pl.program_id(0)
    b = pl.program_id(1)
    T = out_ref.shape[0]
    W = sems.shape[0]
    base = b * s_pad + j * T

    def start(r, tok):
        pltpu.make_async_copy(
            table_hbm.at[pl.ds(tok, 1), :],
            out_ref.at[pl.ds(r, 1), :],
            sems.at[r % W],
        ).start()

    def wait(r):
        # Shape-matching descriptor for the wait (src row index is irrelevant).
        pltpu.make_async_copy(
            table_hbm.at[pl.ds(0, 1), :],
            out_ref.at[pl.ds(r, 1), :],
            sems.at[r % W],
        ).wait()

    # Pipelined row gather with up to W DMAs in flight.  The SMEM id read is
    # hoisted BEFORE the wait so .wait() does not break sst->sld forwarding on
    # the scalar path that builds the next descriptor.
    for r in range(T):
        tok = ids_ref[base + r]
        if r >= W:
            wait(r - W)
        start(r, tok)
    for r in range(max(0, T - W), T):
        wait(r)

    # Positional-encoding add on the gathered tile (VPU, all in VMEM).
    out_ref[...] = out_ref[...] + pos_ref[...]


# --------------------------------------------------------------------------
# Positional encoding (mirrors the PyTorch loop exactly, including the
# non-standard 2*i exponent where i itself steps by 2)
# --------------------------------------------------------------------------

def create_position_encoding(max_len: int, embed_size: int) -> jnp.ndarray:
    pe = np.zeros((max_len, embed_size), dtype=np.float32)
    for pos in range(max_len):
        for i in range(0, embed_size, 2):
            pe[pos, i] = math.sin(pos / 10000 ** (2 * i / embed_size))
            if i + 1 < embed_size:
                pe[pos, i + 1] = math.cos(pos / 10000 ** (2 * i / embed_size))
    return jnp.asarray(pe)  # (max_len, embed_size)


# --------------------------------------------------------------------------
# Wrapper
# --------------------------------------------------------------------------

def transformer_embedding(x, word_embedding_table, position_encoding, *,
                          force_hbm_table=False):
    """Forward pass of TransformerEmbedding.

    x:                    (B, S) int32 token ids
    word_embedding_table: (V, E) float32
    position_encoding:    (max_len, E) float32 (or (1, max_len, E))
    returns:              (B, S, E) float32
    """
    B, S = x.shape
    V, E = word_embedding_table.shape
    pe = position_encoding.reshape(-1, E)          # accept (1, max_len, E) too
    assert S <= pe.shape[0], "seq_len exceeds max_len of positional encoding"

    # --- lane-dense embedding dim (unmasked vst stores) ---------------------
    E_pad = _round_up(E, 128)

    # --- fast path decision: table resident in VMEM? ------------------------
    table_bytes = V * E_pad * 4
    use_vmem_table = (not force_hbm_table) and table_bytes <= 4 * 1024 * 1024

    # --- tile rows along the sequence ---------------------------------------
    # Per-tile byte budget keeps double-buffered out+pos (+ resident table)
    # well under v5e's 16 MiB default scoped VMEM and v7x's 64 MiB physical.
    tile_bytes = 1 << 20
    row_cap = 512 if use_vmem_table else 128   # HBM path is statically unrolled
    max_rows = max(8, min(row_cap, tile_bytes // (E_pad * 4)))
    max_rows = (max_rows // 8) * 8
    T = min(max_rows, _round_up(S, 8))
    S_pad = _round_up(S, T)

    # --- pad operands --------------------------------------------------------
    table = word_embedding_table
    if E_pad != E:
        table = jnp.pad(table, ((0, 0), (0, E_pad - E)))
    pos = jnp.pad(pe[:S], ((0, S_pad - S), (0, E_pad - E)))      # (S_pad, E_pad)

    # Token ids: clamp into range so the gather stays in bounds.
    # (PyTorch nn.Embedding raises on out-of-range ids; we clamp instead.)
    ids = jnp.clip(x.astype(jnp.int32), 0, V - 1)
    if S_pad != S:
        ids = jnp.pad(ids, ((0, 0), (0, S_pad - S)))             # pad with id 0
    ids = ids.reshape(B * S_pad)
    # TODO(synk): chunk ids across multiple pallas_calls if B*S_pad ever grows
    # beyond SMEM capacity (1-D SMEM arrays pad to next_pow2(4N) bytes).

    # Grid: (seq tiles, batch); batch is the inner "arbitrary" axis so the PE
    # tile (index depends only on the seq tile) and the resident table (constant
    # index) are not re-DMA'd across batch steps.
    grid = (S_pad // T, B)

    pos_spec = pl.BlockSpec((T, E_pad), lambda j, b, ids: (j, 0))
    out_spec = pl.BlockSpec((None, T, E_pad), lambda j, b, ids: (b, j, 0))

    common = dict(
        out_shape=jax.ShapeDtypeStruct((B, S_pad, E_pad), jnp.float32),
        compiler_params=pltpu.CompilerParams(
            dimension_semantics=("parallel", "arbitrary"),
            vmem_limit_bytes=32 * 1024 * 1024,
        ),
    )

    if use_vmem_table:
        # Table DMA'd into VMEM once (constant block index) and kept resident.
        table_spec = pl.BlockSpec((V, E_pad), lambda j, b, ids: (0, 0))
        out = pl.pallas_call(
            partial(_embed_kernel_vmem_table, s_pad=S_pad),
            grid_spec=pltpu.PrefetchScalarGridSpec(
                num_scalar_prefetch=1,                 # ids -> SMEM
                grid=grid,
                in_specs=[table_spec, pos_spec],
                out_specs=out_spec,
            ),
            **common,
        )(ids, table, pos)
    else:
        W = min(T, 32)                                 # DMA row copies in flight
        out = pl.pallas_call(
            partial(_embed_kernel_hbm_table, s_pad=S_pad),
            grid_spec=pltpu.PrefetchScalarGridSpec(
                num_scalar_prefetch=1,                 # ids -> SMEM
                grid=grid,
                in_specs=[
                    pl.BlockSpec(memory_space=pl.ANY),  # table stays in HBM
                    pos_spec,
                ],
                out_specs=out_spec,
                scratch_shapes=[pltpu.SemaphoreType.DMA((W,))],
            ),
            **common,
        )(ids, table, pos)

    return out[:, :S, :E]


# --------------------------------------------------------------------------
# Demo / self-test
# --------------------------------------------------------------------------

if __name__ == "__main__":
    vocab_size = 64
    embed_size = 32
    max_len = 16
    batch = 2
    seq = 8

    key = jax.random.PRNGKey(0)
    k_tab, k_ids = jax.random.split(key)

    # Deterministic synthetic parameters (nn.Embedding weight ~ N(0, 1)).
    word_embedding_table = jax.random.normal(
        k_tab, (vocab_size, embed_size), dtype=jnp.float32)
    position_encoding = create_position_encoding(max_len, embed_size)

    # Example input token ids.
    x = jax.random.randint(k_ids, (batch, seq), 0, vocab_size, dtype=jnp.int32)

    # Pure-JAX reference.
    ref = word_embedding_table[x] + position_encoding[None, :seq, :]

    # Fast path: VMEM-resident table.
    out_fast = transformer_embedding(x, word_embedding_table, position_encoding)
    out_fast = jax.block_until_ready(out_fast)
    assert out_fast.shape == (batch, seq, embed_size)
    np.testing.assert_allclose(np.asarray(out_fast), np.asarray(ref),
                               rtol=1e-5, atol=1e-5)

    # Fallback path: HBM-resident table with manual DMA gather (exercised here
    # on the same small shapes for correctness coverage).
    out_hbm = transformer_embedding(x, word_embedding_table, position_encoding,
                                    force_hbm_table=True)
    out_hbm = jax.block_until_ready(out_hbm)
    np.testing.assert_allclose(np.asarray(out_hbm), np.asarray(ref),
                               rtol=1e-5, atol=1e-5)

    print("KERNEL_OK")
</pallas_src>

<mosaic_0001>
module attributes {stable_mosaic.version = 11 : i64} {
  func.func @_embed_kernel_vmem_table(%arg0: i32, %arg1: i32, %arg2: memref<16xi32, #tpu.memory_space<smem>>, %arg3: memref<64x128xf32, #tpu.memory_space<vmem>>, %arg4: memref<8x128xf32, #tpu.memory_space<vmem>>, %arg5: memref<1x8x128xf32, #tpu.memory_space<vmem>>) attributes {dimension_semantics = [#tpu.dimension_semantics<parallel>, #tpu.dimension_semantics<arbitrary>], iteration_bounds = array<i64: 1, 2>, scalar_prefetch = 1 : i64, scratch_operands = 0 : i64, tpu.core_type = #tpu.core_type<tc>, window_params = [{pipeline_mode = #tpu.pipeline_mode<synchronous>, transform_indices = @transform_0, window_bounds = array<i64: 64, 128>}, {transform_indices = @transform_1, window_bounds = array<i64: 8, 128>}, {transform_indices = @transform_2, window_bounds = array<i64: 1, 8, 128>}]} {
    %c8_i32 = arith.constant 8 : i32
    %0 = arith.muli %arg1, %c8_i32 : i32
    %c8_i32_0 = arith.constant 8 : i32
    %1 = arith.muli %arg0, %c8_i32_0 : i32
    %2 = arith.addi %0, %1 : i32
    %c0_i32 = arith.constant 0 : i32
    %3 = arith.addi %2, %c0_i32 : i32
    %4 = arith.index_cast %3 : i32 to index
    %5 = memref.load %arg2[%4] : memref<16xi32, #tpu.memory_space<smem>>
    %6 = arith.index_cast %5 : i32 to index
    %c0 = arith.constant 0 : index
    %7 = vector.load %arg3[%6, %c0] : memref<64x128xf32, #tpu.memory_space<vmem>>, vector<1x128xf32>
    %8 = arith.index_cast %c0_i32 : i32 to index
    %c0_1 = arith.constant 0 : index
    %9 = vector.load %arg4[%8, %c0_1] : memref<8x128xf32, #tpu.memory_space<vmem>>, vector<1x128xf32>
    %10 = arith.addf %7, %9 : vector<1x128xf32>
    %c0_2 = arith.constant 0 : index
    %11 = arith.index_cast %c0_i32 : i32 to index
    %c0_3 = arith.constant 0 : index
    %12 = vector.load %arg5[%c0_2, %11, %c0_3] : memref<1x8x128xf32, #tpu.memory_space<vmem>>, vector<1x1x128xf32>
    %13 = vector.shape_cast %12 : vector<1x1x128xf32> to vector<1x128xf32>
    %14 = vector.shape_cast %10 : vector<1x128xf32> to vector<1x1x128xf32>
    tpu.vector_store %arg5[%c0_2, %11, %c0_3], %14 {strides = array<i32>} : memref<1x8x128xf32, #tpu.memory_space<vmem>>, vector<1x1x128xf32>,
    %c1_i32 = arith.constant 1 : i32
    %15 = arith.addi %2, %c1_i32 : i32
    %16 = arith.index_cast %15 : i32 to index
    %17 = memref.load %arg2[%16] : memref<16xi32, #tpu.memory_space<smem>>
    %18 = arith.index_cast %17 : i32 to index
    %c0_4 = arith.constant 0 : index
    %19 = vector.load %arg3[%18, %c0_4] : memref<64x128xf32, #tpu.memory_space<vmem>>, vector<1x128xf32>
    %20 = arith.index_cast %c1_i32 : i32 to index
    %c0_5 = arith.constant 0 : index
    %21 = vector.load %arg4[%20, %c0_5] : memref<8x128xf32, #tpu.memory_space<vmem>>, vector<1x128xf32>
    %22 = arith.addf %19, %21 : vector<1x128xf32>
    %c0_6 = arith.constant 0 : index
    %23 = arith.index_cast %c1_i32 : i32 to index
    %c0_7 = arith.constant 0 : index
    %24 = vector.load %arg5[%c0_6, %23, %c0_7] : memref<1x8x128xf32, #tpu.memory_space<vmem>>, vector<1x1x128xf32>
    %25 = vector.shape_cast %24 : vector<1x1x128xf32> to vector<1x128xf32>
    %26 = vector.shape_cast %22 : vector<1x128xf32> to vector<1x1x128xf32>
    tpu.vector_store %arg5[%c0_6, %23, %c0_7], %26 {strides = array<i32>} : memref<1x8x128xf32, #tpu.memory_space<vmem>>, vector<1x1x128xf32>,
    %c2_i32 = arith.constant 2 : i32
    %27 = arith.addi %2, %c2_i32 : i32
    %28 = arith.index_cast %27 : i32 to index
    %29 = memref.load %arg2[%28] : memref<16xi32, #tpu.memory_space<smem>>
    %30 = arith.index_cast %29 : i32 to index
    %c0_8 = arith.constant 0 : index
    %31 = vector.load %arg3[%30, %c0_8] : memref<64x128xf32, #tpu.memory_space<vmem>>, vector<1x128xf32>
    %32 = arith.index_cast %c2_i32 : i32 to index
    %c0_9 = arith.constant 0 : index
    %33 = vector.load %arg4[%32, %c0_9] : memref<8x128xf32, #tpu.memory_space<vmem>>, vector<1x128xf32>
    %34 = arith.addf %31, %33 : vector<1x128xf32>
    %c0_10 = arith.constant 0 : index
    %35 = arith.index_cast %c2_i32 : i32 to index
    %c0_11 = arith.constant 0 : index
    %36 = vector.load %arg5[%c0_10, %35, %c0_11] : memref<1x8x128xf32, #tpu.memory_space<vmem>>, vector<1x1x128xf32>
    %37 = vector.shape_cast %36 : vector<1x1x128xf32> to vector<1x128xf32>
    %38 = vector.shape_cast %34 : vector<1x128xf32> to vector<1x1x128xf32>
    tpu.vector_store %arg5[%c0_10, %35, %c0_11], %38 {strides = array<i32>} : memref<1x8x128xf32, #tpu.memory_space<vmem>>, vector<1x1x128xf32>,
    %c3_i32 = arith.constant 3 : i32
    %39 = arith.addi %2, %c3_i32 : i32
    %40 = arith.index_cast %39 : i32 to index
    %41 = memref.load %arg2[%40] : memref<16xi32, #tpu.memory_space<smem>>
    %42 = arith.index_cast %41 : i32 to index
    %c0_12 = arith.constant 0 : index
    %43 = vector.load %arg3[%42, %c0_12] : memref<64x128xf32, #tpu.memory_space<vmem>>, vector<1x128xf32>
    %44 = arith.index_cast %c3_i32 : i32 to index
    %c0_13 = arith.constant 0 : index
    %45 = vector.load %arg4[%44, %c0_13] : memref<8x128xf32, #tpu.memory_space<vmem>>, vector<1x128xf32>
    %46 = arith.addf %43, %45 : vector<1x128xf32>
    %c0_14 = arith.constant 0 : index
    %47 = arith.index_cast %c3_i32 : i32 to index
    %c0_15 = arith.constant 0 : index
    %48 = vector.load %arg5[%c0_14, %47, %c0_15] : memref<1x8x128xf32, #tpu.memory_space<vmem>>, vector<1x1x128xf32>
    %49 = vector.shape_cast %48 : vector<1x1x128xf32> to vector<1x128xf32>
    %50 = vector.shape_cast %46 : vector<1x128xf32> to vector<1x1x128xf32>
    tpu.vector_store %arg5[%c0_14, %47, %c0_15], %50 {strides = array<i32>} : memref<1x8x128xf32, #tpu.memory_space<vmem>>, vector<1x1x128xf32>,
    %c4_i32 = arith.constant 4 : i32
    %51 = arith.addi %2, %c4_i32 : i32
    %52 = arith.index_cast %51 : i32 to index
    %53 = memref.load %arg2[%52] : memref<16xi32, #tpu.memory_space<smem>>
    %54 = arith.index_cast %53 : i32 to index
    %c0_16 = arith.constant 0 : index
    %55 = vector.load %arg3[%54, %c0_16] : memref<64x128xf32, #tpu.memory_space<vmem>>, vector<1x128xf32>
    %56 = arith.index_cast %c4_i32 : i32 to index
    %c0_17 = arith.constant 0 : index
    %57 = vector.load %arg4[%56, %c0_17] : memref<8x128xf32, #tpu.memory_space<vmem>>, vector<1x128xf32>
    %58 = arith.addf %55, %57 : vector<1x128xf32>
    %c0_18 = arith.constant 0 : index
    %59 = arith.index_cast %c4_i32 : i32 to index
    %c0_19 = arith.constant 0 : index
    %60 = vector.load %arg5[%c0_18, %59, %c0_19] : memref<1x8x128xf32, #tpu.memory_space<vmem>>, vector<1x1x128xf32>
    %61 = vector.shape_cast %60 : vector<1x1x128xf32> to vector<1x128xf32>
    %62 = vector.shape_cast %58 : vector<1x128xf32> to vector<1x1x128xf32>
    tpu.vector_store %arg5[%c0_18, %59, %c0_19], %62 {strides = array<i32>} : memref<1x8x128xf32, #tpu.memory_space<vmem>>, vector<1x1x128xf32>,
    %c5_i32 = arith.constant 5 : i32
    %63 = arith.addi %2, %c5_i32 : i32
    %64 = arith.index_cast %63 : i32 to index
    %65 = memref.load %arg2[%64] : memref<16xi32, #tpu.memory_space<smem>>
    %66 = arith.index_cast %65 : i32 to index
    %c0_20 = arith.constant 0 : index
    %67 = vector.load %arg3[%66, %c0_20] : memref<64x128xf32, #tpu.memory_space<vmem>>, vector<1x128xf32>
    %68 = arith.index_cast %c5_i32 : i32 to index
    %c0_21 = arith.constant 0 : index
    %69 = vector.load %arg4[%68, %c0_21] : memref<8x128xf32, #tpu.memory_space<vmem>>, vector<1x128xf32>
    %70 = arith.addf %67, %69 : vector<1x128xf32>
    %c0_22 = arith.constant 0 : index
    %71 = arith.index_cast %c5_i32 : i32 to index
    %c0_23 = arith.constant 0 : index
    %72 = vector.load %arg5[%c0_22, %71, %c0_23] : memref<1x8x128xf32, #tpu.memory_space<vmem>>, vector<1x1x128xf32>
    %73 = vector.shape_cast %72 : vector<1x1x128xf32> to vector<1x128xf32>
    %74 = vector.shape_cast %70 : vector<1x128xf32> to vector<1x1x128xf32>
    tpu.vector_store %arg5[%c0_22, %71, %c0_23], %74 {strides = array<i32>} : memref<1x8x128xf32, #tpu.memory_space<vmem>>, vector<1x1x128xf32>,
    %c6_i32 = arith.constant 6 : i32
    %75 = arith.addi %2, %c6_i32 : i32
    %76 = arith.index_cast %75 : i32 to index
    %77 = memref.load %arg2[%76] : memref<16xi32, #tpu.memory_space<smem>>
    %78 = arith.index_cast %77 : i32 to index
    %c0_24 = arith.constant 0 : index
    %79 = vector.load %arg3[%78, %c0_24] : memref<64x128xf32, #tpu.memory_space<vmem>>, vector<1x128xf32>
    %80 = arith.index_cast %c6_i32 : i32 to index
    %c0_25 = arith.constant 0 : index
    %81 = vector.load %arg4[%80, %c0_25] : memref<8x128xf32, #tpu.memory_space<vmem>>, vector<1x128xf32>
    %82 = arith.addf %79, %81 : vector<1x128xf32>
    %c0_26 = arith.constant 0 : index
    %83 = arith.index_cast %c6_i32 : i32 to index
    %c0_27 = arith.constant 0 : index
    %84 = vector.load %arg5[%c0_26, %83, %c0_27] : memref<1x8x128xf32, #tpu.memory_space<vmem>>, vector<1x1x128xf32>
    %85 = vector.shape_cast %84 : vector<1x1x128xf32> to vector<1x128xf32>
    %86 = vector.shape_cast %82 : vector<1x128xf32> to vector<1x1x128xf32>
    tpu.vector_store %arg5[%c0_26, %83, %c0_27], %86 {strides = array<i32>} : memref<1x8x128xf32, #tpu.memory_space<vmem>>, vector<1x1x128xf32>,
    %c7_i32 = arith.constant 7 : i32
    %87 = arith.addi %2, %c7_i32 : i32
    %88 = arith.index_cast %87 : i32 to index
    %89 = memref.load %arg2[%88] : memref<16xi32, #tpu.memory_space<smem>>
    %90 = arith.index_cast %89 : i32 to index
    %c0_28 = arith.constant 0 : index
    %91 = vector.load %arg3[%90, %c0_28] : memref<64x128xf32, #tpu.memory_space<vmem>>, vector<1x128xf32>
    %92 = arith.index_cast %c7_i32 : i32 to index
    %c0_29 = arith.constant 0 : index
    %93 = vector.load %arg4[%92, %c0_29] : memref<8x128xf32, #tpu.memory_space<vmem>>, vector<1x128xf32>
    %94 = arith.addf %91, %93 : vector<1x128xf32>
    %c0_30 = arith.constant 0 : index
    %95 = arith.index_cast %c7_i32 : i32 to index
    %c0_31 = arith.constant 0 : index
    %96 = vector.load %arg5[%c0_30, %95, %c0_31] : memref<1x8x128xf32, #tpu.memory_space<vmem>>, vector<1x1x128xf32>
    %97 = vector.shape_cast %96 : vector<1x1x128xf32> to vector<1x128xf32>
    %98 = vector.shape_cast %94 : vector<1x128xf32> to vector<1x1x128xf32>
    tpu.vector_store %arg5[%c0_30, %95, %c0_31], %98 {strides = array<i32>} : memref<1x8x128xf32, #tpu.memory_space<vmem>>, vector<1x1x128xf32>,
    %c8_i32_32 = arith.constant 8 : i32
    return
  }
  func.func @transform_0(%arg0: i32, %arg1: i32, %arg2: memref<16xi32, #tpu.memory_space<smem>>) -> (i32, i32) {
    %c0_i32 = arith.constant 0 : i32
    %c0_i32_0 = arith.constant 0 : i32
    %c0_i32_1 = arith.constant 0 : i32
    return %c0_i32, %c0_i32_0 : i32, i32
  }
  func.func @transform_1(%arg0: i32, %arg1: i32, %arg2: memref<16xi32, #tpu.memory_space<smem>>) -> (i32, i32) {
    %c0_i32 = arith.constant 0 : i32
    %c0_i32_0 = arith.constant 0 : i32
    return %arg0, %c0_i32 : i32, i32
  }
  func.func @transform_2(%arg0: i32, %arg1: i32, %arg2: memref<16xi32, #tpu.memory_space<smem>>) -> (i32, i32, i32) {
    %c0_i32 = arith.constant 0 : i32
    %c0_i32_0 = arith.constant 0 : i32
    return %arg1, %arg0, %c0_i32 : i32, i32, i32
  }
}

</mosaic_0001>

<bundles_post_ra>
// kernel: tpu_custom_call.1
= control target key start
LH: loop header
LB: loop body
LE: loop exit
PB: predicated region body
PF: predicated region fallthrough
CT: control target
= control target key end

     0   :  { %s578_s12 = smov [#allocation3]   ;;  %s774_s0 = inlined_call_operand.hbm [shape: s32[16], index: 0, kind: input, shape index: {}]   ;;  %s775_s1 = inlined_call_operand.hbm [shape: f32[64,128], index: 1, kind: input, shape index: {}]   ;;  %s776_s2 = inlined_call_operand.hbm [shape: f32[8,128], index: 2, kind: input, shape index: {}]   ;;  %s777_s3 = inlined_call_operand.hbm [shape: f32[2,8,128], index: 3, kind: output, shape index: {}]  }
   0x1   :  { %9 = dma.hbm_to_smem %s774_s0, 16, %s578_s12, [#allocation2] }
   0x2   :  { %540 = dma.done.wait [#allocation2], 16 }
   0x3   :  { %541 = vsyncadd [#allocation2], 4294967280 }
   0x4   :  { %11 = sfence }
   0x5   :  { %12 = vsyncpa [#allocation5], 0 }
   0x6   :  { %13 = vsyncpa [#allocation8], 0 }
   0x7   :  { %14 = vsyncpa [#allocation6], 0 }
   0x8   :  { %16 = vsyncpa [#allocation6 + $0x1], 0  ;;  %s607_s15 = smov 0   ;;  %s609_s16 = smov 0  }
   0x9   :  { %s611_s17 = smov 0   ;;  %s613_s18 = smov 0  }
   0xa   :  { %s615_s19 = smov 0   ;;  %s617_s20 = smov 0  }
   0xb LB: > { %s337_s0 = sadd.s32 4294967295, %s576_s20   ;;  %s338_s21 = sadd.s32 4294967294, %s576_s20   ;;  %s576_s20 = sphi %s617_s20, %s22_s20   ;;  %s572_s19 = sphi %s615_s19, %s790_s19   ;;  %s568_s18 = sphi %s613_s18, %s789_s18   ;;  %s564_s17 = sphi %s611_s17, %s788_s17   ;;  %s560_s16 = sphi %s609_s16, %s787_s16   ;;  %s556_s15 = sphi %s607_s15, %s786_s15  }
   0xc   : > { %s31_s22 = sadd.s32 1, %s572_s19  ;;  %s90_s23 = sadd.s32 1, %s564_s17 }
   0xd   : > { %p32_p0 = scmp.ge.s32.totalorder %s31_s22, 2  ;;  %p100_p1 = scmp.ne.s32.totalorder %s564_s17, %s560_s16 }
   0xe   : > { %p101_p2 = scmp.eq.s32.totalorder %s337_s0, 1  ;;  %p106_p3 = scmp.ne.s32.totalorder %s560_s16, %s556_s15 }
   0xf   : > { %s792_s22 = smov (%p32_p0, %s31_s22), 0  ;;  %p107_p5 = scmp.eq.s32.totalorder %s338_s21, 1 }
  0x10   : > { %p647_p4 = por %p101_p2, %p100_p1  ;;  %s85_s25 = ssub.s32 %s572_s19, %s792_s22 }
  0x11   : > { %p339_p6 = scmp.ge.s32.totalorder %s576_s20, 1  ;;  %p88_p7 = scmp.eq.s32.totalorder %s85_s25, 0 }
  0x12   : > { %s779_s24 = scalar_select %p647_p4, 1, 0 }
  0x13   : > { %p654_p8 = por %p107_p5, %p106_p3  ;;  %p114_p9 = scmp.lt.s32.totalorder %s576_s20, 3 }
  0x14   : > { %s660_s27 = scalar_select %p88_p7, %s564_s17, %s90_s23  }
  0x15   : > { %s780_s26 = scalar_select %p654_p8, 1, 0 }
  0x16   : > { %p662_p10 = pnand %p339_p6, %p114_p9  ;;  %p666_p11 = scmp.eq.s32.totalorder %s337_s0, 0 }
  0x17   : > { %s579_s30 = smov [#allocation4]   ;;  %s580_s6 = smov [#allocation7]  }
  0x18   : > { %p361_p12 = pneg %p662_p10  ;;  %s126_s4 = sshll.u32 %s579_s30, 4  ;;  %s127_s4 = int_to_ptr.vmem [resolvable:$true] %s126_s4 }
  0x19   : > { %s142_s7 = sshll.u32 %s580_s6, 4  ;;  %s449_s8 = scalar_lea.vmem %s127_s4, 1024  ;;  %s143_s7 = int_to_ptr.vmem [resolvable:$true] %s142_s7 }
  0x1a   : > { %p674_p13 = pnand %p666_p11, %p361_p12  ;;  %p450_p1 = scmp.ne.s32.totalorder %s127_s4, %s449_s8 }
  0x1b   : > { %p457_p5 = scmp.lt.s32.totalorder %s127_s4, %s127_s4  ;;  %p458_p6 = scmp.lt.s32.totalorder %s449_s8, %s449_s8 }
  0x1c   : > { %p440_p0 = pneg %p674_p13 }
  0x1d   : > { %p459_p7 = por %p458_p6, %p457_p5 }
  0x1e   : > { %p452_p2 = pnand %p450_p1, %p440_p0 }
  0x20   : > { %p453_p3 = pneg %p452_p2 }
  0x22   : > { %p460_p9 = pnand %p459_p7, %p453_p3 }
  0x24   : > { %463 = shalt.err (!%p460_p9)
}
  0x25   : > { %s581_s9 = smov 128   ;;  %s582_s10 = smov 8  }
  0x26   : > { %364 = dma.hbm_to_vmem [thread:$0]  (!%p674_p13), %s775_s1, 1024, %s127_s4, [#allocation5], %s581_s9, %s581_s9, %s582_s10  }
  0x27   : > { %s475_s13 = scalar_lea.vmem %s143_s7, 128  ;;  %p483_p8 = scmp.lt.s32.totalorder %s143_s7, %s143_s7 }
  0x28   : > { %p476_p12 = scmp.ne.s32.totalorder %s143_s7, %s475_s13  ;;  %p484_p4 = scmp.lt.s32.totalorder %s475_s13, %s475_s13 }
  0x2a   : > { %p478_p1 = pnand %p476_p12, %p440_p0  ;;  %p485_p5 = por %p484_p4, %p483_p8 }
  0x2c   : > { %p479_p2 = pneg %p478_p1 }
  0x2e   : > { %p486_p3 = pnand %p485_p5, %p479_p2 }
  0x30   : > { %489 = shalt.err (!%p486_p3)
}
  0x31   : > { %367 = dma.hbm_to_vmem [thread:$0]  (!%p674_p13), %s776_s2, 128, %s143_s7, [#allocation8]  }
  0x32   : > { %155 = sbr.rel (%p662_p10) target bundleno = 96 (0x60), region = 28 }
  0x37   : > { %543 = dma.done.wait (%p666_p11), [#allocation5], 1024  }
  0x38   : > { %545 = vsyncadd (%p666_p11), [#allocation5], 4294966272 }
  0x39   : > { %547 = dma.done.wait (%p666_p11), [#allocation8], 128  }
  0x3a   : > { %549 = vsyncadd (%p666_p11), [#allocation8], 4294967168  ;;  %s173_s21 = sand.u32 1, %s560_s16   ;;  %s708_s23 = sshll.u32 %s568_s18, 3  ;;  %v182_v0 = vld [vmem:[#allocation7] sm:$0x1] }
  0x3b   : > { %s179_s25 = sld [smem:[#allocation3 + %s708_s23]]  ;;  %s345_s28 = sshll.u32 %s173_s21, 3  ;;  %v189_v3 = vld [vmem:[#allocation7 + $0x1] sm:$0x1]  ;;  %v196_v4 = vld [vmem:[#allocation7 + $0x2] sm:$0x1] }
  0x3c   : > { %s185_s30 = sadd.s32 1, %s708_s23  ;;  %s192_s4 = sadd.s32 2, %s708_s23  ;;  %v203_v6 = vld [vmem:[#allocation7 + $0x3] sm:$0x1]  ;;  %v210_v9 = vld [vmem:[#allocation7 + $0x4] sm:$0x1] }
  0x3d   : > { %s186_s29 = sld [smem:[#allocation3 + %s185_s30]]  ;;  %s199_s5 = sadd.s32 3, %s708_s23  ;;  %v217_v14 = vld [vmem:[#allocation7 + $0x5] sm:$0x1]  ;;  %v224_v16 = vld [vmem:[#allocation7 + $0x6] sm:$0x1] }
  0x3e   : > { %s193_s6 = sld [smem:[#allocation3 + %s192_s4]]  ;;  %s206_s7 = sadd.s32 4, %s708_s23  ;;  %v231_v20 = vld [vmem:[#allocation7 + $0x7] sm:$0x1] }
  0x3f   : > { %s200_s8 = sld [smem:[#allocation3 + %s199_s5]]  ;;  %s213_s9 = sadd.s32 5, %s708_s23 }
  0x40   : > { %s207_s10 = sld [smem:[#allocation3 + %s206_s7]]  ;;  %s220_s13 = sadd.s32 6, %s708_s23 }
  0x41   : > { %s180_s11 = scalar_lea.vmem [#allocation4], %s179_s25  ;;  %s214_s12 = sld [smem:[#allocation3 + %s213_s9]] }
  0x42   : > { %v181_v1 = vld [vmem:[%s180_s11] sm:$0x1]  ;;  %s719_s14 = sld [smem:[#allocation3 + %s220_s13]]  ;;  %s721_s0 = scalar_lea.vmem [#allocation9], %s345_s28 }
  0x43   : > { %v183_v2 = vadd.f32 %v182_v0, %v181_v1  ;;  %s187_s30 = scalar_lea.vmem [#allocation4], %s186_s29  ;;  %s227_s4 = sadd.s32 7, %s708_s23 }
  0x44   : > { %v188_v5 = vld [vmem:[%s187_s30] sm:$0x1]  ;;  %s194_s25 = scalar_lea.vmem [#allocation4], %s193_s6  ;;  %s228_s5 = sld [smem:[#allocation3 + %s227_s4]] }
  0x45   : > { %184 = vst [vmem:[%s721_s0] sm:$0x1] %v183_v2  ;;  %v190_v7 = vadd.f32 %v189_v3, %v188_v5  ;;  %v195_v8 = vld [vmem:[%s194_s25] sm:$0x1]  ;;  %s201_s7 = scalar_lea.vmem [#allocation4], %s200_s8  ;;  %s348_s6 = sshll.u32 %s568_s18, 7 }
  0x46   : > { %v197_v10 = vadd.f32 %v196_v4, %v195_v8  ;;  %v202_v11 = vld [vmem:[%s201_s7] sm:$0x1]  ;;  %s208_s28 = scalar_lea.vmem [#allocation4], %s207_s10  ;;  %s249_s8 = sshll.u32 %s721_s0, 4  ;;  %s250_s8 = int_to_ptr.vmem [resolvable:$true] %s249_s8 }
  0x47   : > { %191 = vst [vmem:[%s721_s0 + $0x1] sm:$0x1] %v190_v7  ;;  %v204_v12 = vadd.f32 %v203_v6, %v202_v11  ;;  %v209_v13 = vld [vmem:[%s208_s28] sm:$0x1]  ;;  %s215_s23 = scalar_lea.vmem [#allocation4], %s214_s12  ;;  %s247_s12 = scalar_lea.hbm %s777_s3, %s348_s6 }
  0x48   : > { %198 = vst [vmem:[%s721_s0 + $0x2] sm:$0x1] %v197_v10  ;;  %v211_v15 = vadd.f32 %v210_v9, %v209_v13  ;;  %v216_v17 = vld [vmem:[%s215_s23] sm:$0x1]  ;;  %s222_s29 = scalar_lea.vmem [#allocation4], %s719_s14  ;;  %s235_s13 = scalar_lea.sflag [#allocation6], %s173_s21 }
  0x49   : > { %205 = vst [vmem:[%s721_s0 + $0x3] sm:$0x1] %v204_v12  ;;  %v218_v18 = vadd.f32 %v217_v14, %v216_v17  ;;  %v223_v19 = vld [vmem:[%s222_s29] sm:$0x1]  ;;  %s490_s14 = scalar_lea.vmem %s250_s8, 128  ;;  %p784_p8 = scmp.ne.s32.totalorder %s779_s24, 0 }
  0x4a   : > { %212 = vst [vmem:[%s721_s0 + $0x4] sm:$0x1] %v211_v15  ;;  %v225_v21 = vadd.f32 %v224_v16, %v223_v19  ;;  %s229_s9 = scalar_lea.vmem [#allocation4], %s228_s5  ;;  %p491_p4 = scmp.ne.s32.totalorder %s250_s8, %s490_s14 }
  0x4b   : > { %219 = vst [vmem:[%s721_s0 + $0x5] sm:$0x1] %v218_v18  ;;  %v230_v22 = vld [vmem:[%s229_s9] sm:$0x1]  ;;  %s583_s18 = smov [#allocation9]  }
  0x4c   : > { %226 = vst [vmem:[%s721_s0 + $0x6] sm:$0x1] %v225_v21  ;;  %v232_v23 = vadd.f32 %v231_v20, %v230_v22  ;;  %p492_p10 = pnand %p491_p4, %p784_p8  ;;  %s494_s30 = sshll.u32 %s583_s18, 4  ;;  %s495_s30 = int_to_ptr.vmem [resolvable:$false] %s494_s30 }
  0x4d   : > { %s496_s4 = scalar_lea.vmem %s495_s30, 256  ;;  %p497_p13 = scmp.lt.s32.totalorder %s250_s8, %s495_s30 }
  0x4e   : > { %233 = vst [vmem:[%s721_s0 + $0x7] sm:$0x1] %v232_v23  ;;  %p493_p11 = pneg %p492_p10  ;;  %p498_p0 = scmp.lt.s32.totalorder %s496_s4, %s490_s14 }
  0x50   : > { %p499_p6 = por %p498_p0, %p497_p13 }
  0x52   : > { %p500_p7 = pnand %p499_p6, %p493_p11 }
  0x54   : > { %503 = shalt.err (!%p500_p7)
}
  0x55   : > { %s504_s25 = scalar_lea.hbm %s247_s12, 128  ;;  %s508_s5 = scalar_lea.hbm %s777_s3, 256 }
  0x56   : > { %p505_p9 = scmp.ne.s32.totalorder %s247_s12, %s504_s25  ;;  %p509_p2 = scmp.lt.s32.totalorder %s247_s12, %s777_s3 }
  0x57   : > { %p510_p5 = scmp.lt.s32.totalorder %s508_s5, %s504_s25 }
  0x58   : > { %p506_p12 = pnand %p505_p9, %p784_p8 }
  0x59   : > { %p511_p3 = por %p510_p5, %p509_p2 }
  0x5a   : > { %p507_p1 = pneg %p506_p12 }
  0x5c   : > { %p512_p4 = pnand %p511_p3, %p507_p1 }
  0x5e   : > { %515 = shalt.err (!%p512_p4)
}
  0x5f   : > { %359 = dma.vmem_to_hbm [thread:$0]  (%p784_p8), %s250_s8, 128, %s247_s12, %s235_s13  }
  0x60 PF: > { %p376_p10 = scmp.ge.s32.totalorder %s576_s20, 2  ;;  %s261_s23 = sand.u32 1, %s556_s15  }
  0x61   : > { %p785_p11 = scmp.ne.s32.totalorder %s780_s26, 0  ;;  %s262_s29 = scalar_lea.sflag [#allocation6], %s261_s23 }
  0x63   : > { %p369_p13 = pnand %p376_p10, %p785_p11 }
  0x65   : > { %p370_p0 = pneg %p369_p13 }
  0x67   : > { %551 = dma.done.wait (%p370_p0), %s262_s29, 128  }
  0x68   : > { %553 = vsyncadd (%p370_p0), %s262_s29, 4294967168  ;;  %s22_s20 = sadd.s32 1, %s576_s20   ;;  %s786_s15 = smov %s560_s16 }
  0x69   : > { %p19_p6 = scmp.ge.s32.totalorder %s22_s20, 4   ;;  %s787_s16 = smov %s564_s17 }
  0x6a   : > { %s788_s17 = smov %s660_s27  ;;  %s789_s18 = smov %s572_s19 }
  0x6b   : > { %s790_s19 = smov %s792_s22  ;;  %21 = sbr.rel (!%p19_p6) target bundleno = 11 (0xb), region = 78 }
  0x70   :  { %267 = vsyncpa [#allocation5], 1 }
  0x71   :  { %269 = vsyncpa [#allocation5 + $0x1], 1 }
  0x72   :  { %270 = vsyncpa [#allocation8], 1 }
  0x73   :  { %271 = vsyncpa [#allocation6], 1 }
  0x74   :  { %273 = vsyncpa [#allocation6 + $0x1], 1 }

</bundles_post_ra>
